<compile_context>
chip_gen: v7x
topology: tpu7x:2x2x1
jax: 0.10.0
libtpu: 0.0.40
codegen_flags: <defaults>
</compile_context>

<pallas_src>
import jax
import jax.numpy as jnp
from jax import lax
from jax.experimental import pallas as pl
from jax.experimental.pallas import tpu as pltpu

MAX_LEN = 100     # matches the PyTorch module
LANE = 128
BATCH_TILE = 8    # one sublane group of hidden rows per grid step


def _genattn_kernel(len_ref, h_ref, w_ref, b_ref, enc_t_ref, out_ref):
    """One batch tile of GenAttn.

    len_ref   : SMEM (1,) int32   -- true sequence length (scalar prefetch)
    h_ref     : (BT, H)           -- batch tile of decoder hidden states
    w_ref     : (H, 2H)           -- attn.weight (natural nn.Linear layout)
    b_ref     : (1, H)            -- attn.bias
    enc_t_ref : (2H, S_pad)       -- encoder outputs, pre-transposed + zero padded
    out_ref   : (BT, S_pad)       -- softmax(attention energies), lane dense
    """
    f32 = jnp.float32
    seq_len = len_ref[0]

    h = h_ref[...]                       # (BT, H)   native dtype
    w = w_ref[...]                       # (H, 2H)   native dtype
    enc_t = enc_t_ref[...]               # (2H, S_pad) native dtype -> MXU, f32 acc

    # Algebraic collapse of Linear + dot:
    #   hidden . (W e + bias) == (hidden @ W) . e + hidden . bias
    v = jnp.dot(h, w, preferred_element_type=f32)                  # (BT, 2H) f32
    c = jnp.sum(h.astype(f32) * b_ref[...].astype(f32),
                axis=1, keepdims=True)                             # (BT, 1)

    # Plain (BT,2H)@(2H,S_pad) matmul: enc arrives pre-transposed so Mosaic
    # inserts no vxpose, and the result is lane-dense along the sequence.
    scores = jnp.dot(v.astype(enc_t.dtype), enc_t,
                     preferred_element_type=f32) + c               # (BT, S_pad)

    # Mask padded sequence lanes to -inf so they receive zero attention weight.
    lane = lax.broadcasted_iota(jnp.int32, scores.shape, 1)
    scores = jnp.where(lane < seq_len, scores, -jnp.inf)

    # Numerically stable softmax over the sequence (lane) axis.
    m = jnp.max(scores, axis=1, keepdims=True)                     # (BT, 1)
    e = jnp.exp(scores - m)                                        # (BT, S_pad)
    denom = jnp.sum(e, axis=1, keepdims=True)                      # (BT, 1)
    r = pl.reciprocal(denom, approx=True)                          # EUP reciprocal
    r = r * (2.0 - denom * r)                                      # Newton step
    out_ref[...] = (e * r).astype(out_ref.dtype)


def gen_attn_batched(hidden_batch, encoder_outputs, W, b, *, batch_tile=BATCH_TILE):
    """hidden_batch (B, H), encoder_outputs (S, 2H), W (H, 2H), b (H,) -> (B, S)."""
    B, H = hidden_batch.shape
    S, H2 = encoder_outputs.shape
    assert H2 == 2 * H and W.shape == (H, H2) and b.shape == (H,)

    # Static shapes: pad sequence to a fixed 128-aligned length (>= MAX_LEN) so
    # all S <= MAX_LEN reuse a single compilation; pad batch to the tile size.
    s_pad = LANE * pl.cdiv(max(S, MAX_LEN), LANE)
    b_pad = batch_tile * pl.cdiv(B, batch_tile)

    enc_t = jnp.pad(encoder_outputs, ((0, s_pad - S), (0, 0))).T   # (2H, s_pad)
    h_b = jnp.pad(hidden_batch, ((0, b_pad - B), (0, 0)))          # (b_pad, H)
    b2 = b.reshape(1, H)
    seq_len = jnp.full((1,), S, dtype=jnp.int32)

    out = pl.pallas_call(
        _genattn_kernel,
        out_shape=jax.ShapeDtypeStruct((b_pad, s_pad), jnp.float32),
        grid_spec=pltpu.PrefetchScalarGridSpec(
            num_scalar_prefetch=1,
            grid=(b_pad // batch_tile,),
            in_specs=[
                pl.BlockSpec((batch_tile, H), lambda i, L: (i, 0)),   # hidden tile
                pl.BlockSpec((H, H2), lambda i, L: (0, 0)),           # W
                pl.BlockSpec((1, H), lambda i, L: (0, 0)),            # bias
                pl.BlockSpec((H2, s_pad), lambda i, L: (0, 0)),       # enc^T (shared)
            ],
            out_specs=pl.BlockSpec((batch_tile, s_pad), lambda i, L: (i, 0)),
        ),
        compiler_params=pltpu.CompilerParams(
            # batch-tile axis is independent -> let v7x's two TCs split it
            dimension_semantics=("parallel",)),
    )(seq_len, h_b, W, b2, enc_t)

    return out[:B, :S]


def gen_attn(hidden, encoder_outputs, W, b):
    """Module-faithful forward: hidden (H,), enc (S, 2H) -> (1, 1, S)."""
    S = encoder_outputs.shape[0]
    w = gen_attn_batched(hidden[None, :], encoder_outputs, W, b)   # (1, S)
    # unsqueeze(0).unsqueeze(0): free leading-dim reshape
    return w.reshape(1, 1, S)


def gen_attn_ref(hidden, encoder_outputs, W, b):
    # Direct transcription of the PyTorch module (un-collapsed form).
    energy = encoder_outputs @ W.T + b            # (S, H)
    scores = energy @ hidden                      # (S,)
    return jax.nn.softmax(scores, axis=0).reshape(1, 1, -1)


if __name__ == "__main__":
    H = 32          # hidden_size
    S = 8           # seq_len  (<= MAX_LEN)

    key = jax.random.PRNGKey(0)
    k_w, k_b, k_h, k_e = jax.random.split(key, 4)

    # deterministic synthetic parameters (nn.Linear(2H, H): W (H, 2H), b (H,))
    W = jax.random.normal(k_w, (H, 2 * H), dtype=jnp.float32) * 0.1
    b = jax.random.normal(k_b, (H,), dtype=jnp.float32) * 0.1

    hidden = jax.random.normal(k_h, (H,), dtype=jnp.float32)
    encoder_outputs = jax.random.normal(k_e, (S, 2 * H), dtype=jnp.float32)

    # Module-faithful single-vector forward.
    out = gen_attn(hidden, encoder_outputs, W, b)
    jax.block_until_ready(out)
    ref = gen_attn_ref(hidden, encoder_outputs, W, b)
    assert out.shape == (1, 1, S)
    assert jnp.allclose(out, ref, atol=1e-5, rtol=1e-4)
    assert jnp.allclose(jnp.sum(out), 1.0, atol=1e-5)

    # Batched path (beam/batch of hidden rows) against a vmapped reference.
    B = 4
    hb = jax.random.normal(jax.random.PRNGKey(1), (B, H), dtype=jnp.float32)
    wb = gen_attn_batched(hb, encoder_outputs, W, b)
    jax.block_until_ready(wb)
    refb = jax.vmap(
        lambda hh: gen_attn_ref(hh, encoder_outputs, W, b).reshape(-1))(hb)
    assert wb.shape == (B, S)
    assert jnp.allclose(wb, refb, atol=1e-5, rtol=1e-4)

    print("KERNEL_OK")
</pallas_src>

<mosaic_0001>
module attributes {stable_mosaic.version = 11 : i64} {
  func.func @_genattn_kernel(%arg0: i32, %arg1: memref<1xi32, #tpu.memory_space<smem>>, %arg2: memref<8x32xf32, #tpu.memory_space<vmem>>, %arg3: memref<32x64xf32, #tpu.memory_space<vmem>>, %arg4: memref<1x32xf32, #tpu.memory_space<vmem>>, %arg5: memref<64x128xf32, #tpu.memory_space<vmem>>, %arg6: memref<8x128xf32, #tpu.memory_space<vmem>>) attributes {dimension_semantics = [#tpu.dimension_semantics<parallel>], iteration_bounds = array<i64: 1>, scalar_prefetch = 1 : i64, scratch_operands = 0 : i64, tpu.core_type = #tpu.core_type<tc>, window_params = [{transform_indices = @transform_0, window_bounds = array<i64: 8, 32>}, {pipeline_mode = #tpu.pipeline_mode<synchronous>, transform_indices = @transform_1, window_bounds = array<i64: 32, 64>}, {pipeline_mode = #tpu.pipeline_mode<synchronous>, transform_indices = @transform_2, window_bounds = array<i64: 1, 32>}, {pipeline_mode = #tpu.pipeline_mode<synchronous>, transform_indices = @transform_3, window_bounds = array<i64: 64, 128>}, {transform_indices = @transform_4, window_bounds = array<i64: 8, 128>}]} {
    %c0 = arith.constant 0 : index
    %0 = memref.load %arg1[%c0] : memref<1xi32, #tpu.memory_space<smem>>
    %c0_0 = arith.constant 0 : index
    %c0_1 = arith.constant 0 : index
    %1 = vector.load %arg2[%c0_0, %c0_1] : memref<8x32xf32, #tpu.memory_space<vmem>>, vector<8x32xf32>
    %c0_2 = arith.constant 0 : index
    %c0_3 = arith.constant 0 : index
    %2 = vector.load %arg3[%c0_2, %c0_3] : memref<32x64xf32, #tpu.memory_space<vmem>>, vector<32x64xf32>
    %c0_4 = arith.constant 0 : index
    %c0_5 = arith.constant 0 : index
    %3 = vector.load %arg5[%c0_4, %c0_5] : memref<64x128xf32, #tpu.memory_space<vmem>>, vector<64x128xf32>
    %cst = arith.constant dense<0.000000e+00> : vector<8x64xf32>
    %4 = tpu.matmul %1, %2, %cst {dimension_numbers = #tpu.dot_dimension_numbers<[1], [0], [0], [1], [0, 0, 1, 1], [], []>} : vector<8x32xf32>, vector<32x64xf32>, vector<8x64xf32> -> vector<8x64xf32>
    %c0_6 = arith.constant 0 : index
    %c0_7 = arith.constant 0 : index
    %5 = vector.load %arg4[%c0_6, %c0_7] : memref<1x32xf32, #tpu.memory_space<vmem>>, vector<1x32xf32>
    %6 = vector.broadcast %5 : vector<1x32xf32> to vector<8x32xf32>
    %7 = arith.mulf %1, %6 : vector<8x32xf32>
    %cst_8 = arith.constant dense<0.000000e+00> : vector<8xf32>
    %8 = vector.multi_reduction <add>, %7, %cst_8 [1] : vector<8x32xf32> to vector<8xf32>
    %9 = vector.shape_cast %8 : vector<8xf32> to vector<8x1xf32>
    %cst_9 = arith.constant dense<0.000000e+00> : vector<8x128xf32>
    %10 = tpu.matmul %4, %3, %cst_9 {dimension_numbers = #tpu.dot_dimension_numbers<[1], [0], [0], [1], [0, 0, 1, 1], [], []>} : vector<8x64xf32>, vector<64x128xf32>, vector<8x128xf32> -> vector<8x128xf32>
    %11 = vector.broadcast %9 : vector<8x1xf32> to vector<8x128xf32>
    %12 = arith.addf %10, %11 : vector<8x128xf32>
    %13 = tpu.iota {dimensions = array<i32: 1>} : vector<8x128xi32>
    %14 = vector.broadcast %0 : i32 to vector<8x128xi32>
    %15 = arith.cmpi slt, %13, %14 : vector<8x128xi32>
    %cst_10 = arith.constant 0xFF800000 : f32
    %16 = vector.broadcast %cst_10 : f32 to vector<8x128xf32>
    %17 = arith.select %15, %12, %16 : vector<8x128xi1>, vector<8x128xf32>
    %cst_11 = arith.constant dense<0xFF800000> : vector<8xf32>
    %18 = vector.multi_reduction <maximumf>, %17, %cst_11 [1] : vector<8x128xf32> to vector<8xf32>
    %19 = vector.shape_cast %18 : vector<8xf32> to vector<8x1xf32>
    %20 = vector.broadcast %19 : vector<8x1xf32> to vector<8x128xf32>
    %21 = arith.subf %17, %20 : vector<8x128xf32>
    %22 = math.exp %21 : vector<8x128xf32>
    %cst_12 = arith.constant dense<0.000000e+00> : vector<8xf32>
    %23 = vector.multi_reduction <add>, %22, %cst_12 [1] : vector<8x128xf32> to vector<8xf32>
    %24 = vector.shape_cast %23 : vector<8xf32> to vector<8x1xf32>
    %25 = tpu.reciprocal %24 {approx = true} : vector<8x1xf32> -> vector<8x1xf32>
    %26 = arith.mulf %24, %25 : vector<8x1xf32>
    %cst_13 = arith.constant 2.000000e+00 : f32
    %27 = vector.broadcast %cst_13 : f32 to vector<8x1xf32>
    %28 = arith.subf %27, %26 : vector<8x1xf32>
    %29 = arith.mulf %25, %28 : vector<8x1xf32>
    %30 = vector.broadcast %29 : vector<8x1xf32> to vector<8x128xf32>
    %31 = arith.mulf %22, %30 : vector<8x128xf32>
    %c0_14 = arith.constant 0 : index
    %c0_15 = arith.constant 0 : index
    %32 = vector.load %arg6[%c0_14, %c0_15] : memref<8x128xf32, #tpu.memory_space<vmem>>, vector<8x128xf32>
    tpu.vector_store %arg6[%c0_14, %c0_15], %31 {strides = array<i32>} : memref<8x128xf32, #tpu.memory_space<vmem>>, vector<8x128xf32>,
    return
  }
  func.func @transform_0(%arg0: i32, %arg1: memref<1xi32, #tpu.memory_space<smem>>) -> (i32, i32) {
    %c0_i32 = arith.constant 0 : i32
    %c0_i32_0 = arith.constant 0 : i32
    return %arg0, %c0_i32 : i32, i32
  }
  func.func @transform_1(%arg0: i32, %arg1: memref<1xi32, #tpu.memory_space<smem>>) -> (i32, i32) {
    %c0_i32 = arith.constant 0 : i32
    %c0_i32_0 = arith.constant 0 : i32
    %c0_i32_1 = arith.constant 0 : i32
    return %c0_i32, %c0_i32_0 : i32, i32
  }
  func.func @transform_2(%arg0: i32, %arg1: memref<1xi32, #tpu.memory_space<smem>>) -> (i32, i32) {
    %c0_i32 = arith.constant 0 : i32
    %c0_i32_0 = arith.constant 0 : i32
    %c0_i32_1 = arith.constant 0 : i32
    return %c0_i32, %c0_i32_0 : i32, i32
  }
  func.func @transform_3(%arg0: i32, %arg1: memref<1xi32, #tpu.memory_space<smem>>) -> (i32, i32) {
    %c0_i32 = arith.constant 0 : i32
    %c0_i32_0 = arith.constant 0 : i32
    %c0_i32_1 = arith.constant 0 : i32
    return %c0_i32, %c0_i32_0 : i32, i32
  }
  func.func @transform_4(%arg0: i32, %arg1: memref<1xi32, #tpu.memory_space<smem>>) -> (i32, i32) {
    %c0_i32 = arith.constant 0 : i32
    %c0_i32_0 = arith.constant 0 : i32
    return %arg0, %c0_i32 : i32, i32
  }
}

</mosaic_0001>

<bundles_post_ra>
// kernel: tpu_custom_call.1
= control target key start
LH: loop header
LB: loop body
LE: loop exit
PB: predicated region body
PF: predicated region fallthrough
CT: control target
= control target key end

     0   :  { %11 = vsyncpa [#allocation5], 0  ;;  %s537_s0 = inlined_call_operand.<no memory space> [shape: s32[1], index: 0, kind: input, shape index: {}]   ;;  %s538_s1 = inlined_call_operand.hbm [shape: f32[8,32], index: 1, kind: input, shape index: {}]   ;;  %s539_s2 = inlined_call_operand.hbm [shape: f32[32,64], index: 2, kind: input, shape index: {}]   ;;  %s540_s3 = inlined_call_operand.vmem [shape: f32[1,32], index: 3, kind: input, shape index: {}]   ;;  %s541_s4 = inlined_call_operand.hbm [shape: f32[64,128], index: 4, kind: input, shape index: {}]   ;;  %s542_s5 = inlined_call_operand.hbm [shape: f32[8,128], index: 5, kind: output, shape index: {}]  }
   0x1   :  { %12 = vsyncpa [#allocation8], 0 }
   0x2   :  { %13 = vsyncpa [#allocation6], 0  ;;  %s438_s18 = smov [#allocation7]   ;;  %s344_s22 = scalar_lea.hbm %s539_s2, 512 }
   0x3   :  { %s29_s19 = sshll.u32 %s438_s18, 4  ;;  %p345_p0 = scmp.ne.s32.totalorder %s539_s2, %s344_s22  ;;  %s30_s19 = int_to_ptr.vmem [resolvable:$true] %s29_s19 }
   0x4   :  { %p348_p1 = scmp.lt.u32.totalorder %s344_s22, %s539_s2 }
   0x6   :  { %p350_p2 = pnand %p348_p1, %p345_p0 }
   0x8   :  { %353 = shalt.err (!%p350_p2)
}
   0x9   :  { %s354_s27 = scalar_lea.vmem %s30_s19, 512  ;;  %p359_p4 = scmp.lt.s32.totalorder %s30_s19, %s30_s19 }
   0xa   :  { %p355_p3 = scmp.ne.s32.totalorder %s30_s19, %s354_s27  ;;  %p360_p5 = scmp.lt.s32.totalorder %s354_s27, %s354_s27 }
   0xc   :  { %p361_p6 = por %p360_p5, %p359_p4 }
   0xe   :  { %p362_p7 = pnand %p361_p6, %p355_p3 }
  0x10   :  { %365 = shalt.err (!%p362_p7)
}
  0x11   :  { %s439_s28 = smov 128   ;;  %s440_s29 = smov 8  }
  0x12   :  { %35 = dma.hbm_to_vmem [thread:$0]  %s539_s2, 512, %s30_s19, [#allocation8], %s439_s28, %s439_s28, %s440_s29  }
  0x13   :  { %s441_s7 = smov [#allocation4]   ;;  %s442_s9 = smov [#allocation9]  }
  0x14   :  { %s20_s8 = sshll.u32 %s441_s7, 4  ;;  %s43_s10 = sshll.u32 %s442_s9, 4  ;;  %s21_s8 = int_to_ptr.vmem [resolvable:$true] %s20_s8  ;;  %s44_s10 = int_to_ptr.vmem [resolvable:$true] %s43_s10 }
  0x15   :  { %s366_s13 = scalar_lea.hbm %s538_s1, 128 }
  0x16   :  { %p367_p8 = scmp.ne.s32.totalorder %s538_s1, %s366_s13  ;;  %p370_p9 = scmp.lt.u32.totalorder %s366_s13, %s538_s1 }
  0x18   :  { %p372_p10 = pnand %p370_p9, %p367_p8 }
  0x1a   :  { %375 = shalt.err (!%p372_p10)
}
  0x1b   :  { %s376_s2 = scalar_lea.vmem %s21_s8, 128  ;;  %p381_p12 = scmp.lt.s32.totalorder %s21_s8, %s21_s8 }
  0x1c   :  { %p377_p11 = scmp.ne.s32.totalorder %s21_s8, %s376_s2  ;;  %p382_p13 = scmp.lt.s32.totalorder %s376_s2, %s376_s2 }
  0x1e   :  { %p383_p0 = por %p382_p13, %p381_p12 }
  0x20   :  { %p384_p1 = pnand %p383_p0, %p377_p11 }
  0x22   :  { %387 = shalt.err (!%p384_p1)
}
  0x23   :  { %23 = dma.hbm_to_vmem [thread:$0]  %s538_s1, 128, %s21_s8, [#allocation5]  }
  0x24   :  { %s388_s22 = scalar_lea.hbm %s541_s4, 1024 }
  0x25   :  { %p389_p2 = scmp.ne.s32.totalorder %s541_s4, %s388_s22  ;;  %p392_p3 = scmp.lt.u32.totalorder %s388_s22, %s541_s4 }
  0x27   :  { %p394_p4 = pnand %p392_p3, %p389_p2 }
  0x29   :  { %397 = shalt.err (!%p394_p4)
}
  0x2a   :  { %s398_s27 = scalar_lea.vmem %s44_s10, 1024  ;;  %p403_p6 = scmp.lt.s32.totalorder %s44_s10, %s44_s10 }
  0x2b   :  { %p399_p5 = scmp.ne.s32.totalorder %s44_s10, %s398_s27  ;;  %p404_p7 = scmp.lt.s32.totalorder %s398_s27, %s398_s27 }
  0x2d   :  { %p405_p8 = por %p404_p7, %p403_p6 }
  0x2f   :  { %p406_p9 = pnand %p405_p8, %p399_p5 }
  0x31   :  { %409 = shalt.err (!%p406_p9)
}
  0x32   :  { %49 = dma.hbm_to_vmem [thread:$0]  %s541_s4, 1024, %s44_s10, [#allocation8], %s439_s28, %s439_s28, %s440_s29  }
  0x33   :  { %432 = dma.done.wait [#allocation5], 128  }
  0x34   :  { %433 = vsyncadd [#allocation5], 4294967168 }
  0x35   :  { %434 = dma.done.wait [#allocation8], 1536  }
  0x36   :  { %435 = vsyncadd [#allocation8], 4294965760  ;;  %v443_v0 = vmov 0.0|0.0   ;;  %vm444_vm0 = vmmov 0   ;;  %v445_v1 = vmov 0.0   ;;  %v61_v2 = vld [vmem:[#allocation7] sm:$0xff]  ;;  %v232_v26 = vlaneseq }
  0x37   :  { %313 = vmatprep.subr.bf16.mxu0 %v443_v0  ;;  %291 = vmatprep.mubr.msk.f32.mxu0 %vm444_vm0, %v445_v1  ;;  %v62_v3 = vld [vmem:[#allocation7 + $0x8] sm:$0xff]  ;;  %v63_v4 = vld [vmem:[#allocation7 + $0x10] sm:$0xff]  ;;  %v64_v6 = vld [vmem:[#allocation7 + $0x18] sm:$0xff]  ;;  %vm73_vm1 = vcmask 261120   ;;  %vm158_vm2 = vcmask 523264   ;;  %v234_v28 = vstv %s537_s0 }
  0x38   :  { %319 = vmatprep.subr.bf16.mxu1 %v443_v0  ;;  %310 = vmatprep.mubr.msk.f32.mxu1 %vm444_vm0, %v445_v1  ;;  %v314_v5 = vpack.c.bf16 %v62_v3, %v61_v2  ;;  %v65_v7 = vld [vmem:[#allocation9] sm:$0xff]  ;;  %v66_v8 = vld [vmem:[#allocation9 + $0x8] sm:$0xff]  ;;  %v67_v9 = vld [vmem:[#allocation9 + $0x10] sm:$0xff]  ;;  %v317_v11 = vpack.c.bf16 %v64_v6, %v63_v4  ;;  %v233_v27 = vand.u32 127, %v232_v26 }
  0x39   :  { %v68_v10 = vld [vmem:[#allocation9 + $0x18] sm:$0xff]  ;;  %v320_v12 = vpack.c.bf16 %v66_v8, %v65_v7  ;;  %v69_v14 = vld [vmem:[#allocation9 + $0x20] sm:$0xff]  ;;  %v70_v15 = vld [vmem:[#allocation9 + $0x28] sm:$0xff] }
  0x3a   :  { %315 = vmatpush3.bf16.msra.mxu0 %v314_v5  ;;  %v323_v13 = vpack.c.bf16 %v68_v10, %v67_v9  ;;  %v60_v16 = vld [vmem:[#allocation4] sm:$0xff]  ;;  %v326_v17 = vpack.c.bf16 %v70_v15, %v69_v14  ;;  %v71_v18 = vld [vmem:[#allocation9 + $0x30] sm:$0xff]  ;;  %vm235_vm3 = vcmp.lt.s32.totalorder %v233_v27, %v234_v28 }
  0x3b   :  { %316 = vmatprep.subr.bf16.mxu0 %v443_v0  ;;  %321 = vmatpush3.bf16.msra.mxu1 %v320_v12  ;;  %v72_v19 = vld [vmem:[#allocation9 + $0x38] sm:$0xff] }
  0x3c   :  { %322 = vmatprep.subr.bf16.mxu1 %v443_v0  ;;  %v329_v20 = vpack.c.bf16 %v72_v19, %v71_v18  ;;  %v267_v21 = vld [vmem:[%s540_s3] ss:$0 sm:$0xff]  ;;  %s446_s3 = smov [#allocation10]  }
  0x3d   :  { %v154_v22 = vmul.f32 %v267_v21, %v60_v16  ;;  %s256_s0 = sshll.u32 %s446_s3, 4  ;;  %s257_s0 = int_to_ptr.vmem [resolvable:$true] %s256_s0 }
  0x3e   :  { %318 = vmatpush3.bf16.msra.mxu0 %v317_v11  ;;  %s410_s7 = scalar_lea.vmem %s257_s0, 128  ;;  %p415_p11 = scmp.lt.s32.totalorder %s257_s0, %s257_s0 }
  0x3f   :  { %324 = vmatpush3.bf16.msra.mxu1 %v323_v13  ;;  %v155_v23 = vsel %vm73_vm1, %v154_v22, 0.0  ;;  %p411_p10 = scmp.ne.s32.totalorder %s257_s0, %s410_s7  ;;  %p416_p12 = scmp.lt.s32.totalorder %s410_s7, %s410_s7 }
  0x40   :  { %325 = vmatprep.subr.bf16.mxu1 %v443_v0  ;;  %156 = vadd.xlane.f32.xlu0 %v155_v23 }
  0x41   :  { %292 = vmatmul.mubr.msk.f32.vlgmr.msra.gmra.mrb[0].mxu0 %vm73_vm1, %v60_v16  ;;  %p417_p13 = por %p416_p12, %p415_p11 }
  0x43   :  { %327 = vmatpush3.bf16.msra.mxu1 %v326_v17  ;;  %p418_p0 = pnand %p417_p13, %p411_p10 }
  0x44   :  { %328 = vmatprep.subr.bf16.mxu1 %v443_v0 }
  0x47   :  { %330 = vmatpush3.bf16.msra.mxu1 %v329_v20 }
  0xcd   :  { %v157_v29 = vpop.xlane.xlu0 %156 }
 0x114   :  { %v143_v24 = vpop.f32.mrb[0].mxu0 }
 0x115   :  { %v293_v25 = vpop.f32.mrb[1].mxu0  ;;  %311 = vmatmul.mubr.msk.f32.vlgmr.msra.gmra.mrb[0].mxu1 %vm158_vm2, %v143_v24 }
 0x1e8   :  { %v228_v30 = vpop.f32.mrb[0].mxu1 }
 0x1e9   :  { %v229_v31 = vadd.f32 %v228_v30, %v157_v29  ;;  %v312_v32 = vpop.f32.mrb[1].mxu1 }
 0x1eb   :  { %v236_v33 = vsel %vm235_vm3, %v229_v31, -inf }
 0x1ec   :  { %237 = vmax.xlane.f32.xlu0 %v236_v33 }
 0x279   :  { %v238_v34 = vpop.xlane.xlu0 %237 }
 0x27a   :  { %v239_v35 = vsub.f32 %v236_v33, %v238_v34 }
 0x27c   :  { %v240_v36 = vmul.f32 1.442695, %v239_v35 }
 0x27e   :  { %340 = vpow2.f32 %v240_v36 }
 0x288   :  { %v341_v37 = vpop.eup %340 }
 0x289   :  { %242 = vadd.xlane.f32.xlu1 %v341_v37 }
 0x316   :  { %v243_v38 = vpop.xlane.xlu1 %242 }
 0x317   :  { %342 = vrcp.f32 %v243_v38 }
 0x321   :  { %v343_v39 = vpop.eup %342 }
 0x322   :  { %v245_v40 = vmul.f32 %v343_v39, %v243_v38 }
 0x324   :  { %v246_v41 = vsub.f32 2.0, %v245_v40 }
 0x326   :  { %v247_v42 = vmul.f32 %v343_v39, %v246_v41 }
 0x328   :  { %v248_v43 = vmul.f32 %v341_v37, %v247_v42 }
 0x32a   :  { %249 = vst [vmem:[#allocation10] sm:$0xff] %v248_v43 }
 0x32b   :  { %421 = shalt.err (!%p418_p0)
}
 0x32c   :  { %s422_s10 = scalar_lea.hbm %s542_s5, 128 }
 0x32d   :  { %p423_p1 = scmp.ne.s32.totalorder %s542_s5, %s422_s10  ;;  %p426_p2 = scmp.lt.u32.totalorder %s422_s10, %s542_s5 }
 0x32f   :  { %p428_p3 = pnand %p426_p2, %p423_p1 }
 0x331   :  { %431 = shalt.err (!%p428_p3)
}
 0x332   :  { %259 = dma.vmem_to_hbm [thread:$0]  %s257_s0, 128, %s542_s5, [#allocation6]  }
 0x333   :  { %436 = dma.done.wait [#allocation6], 128  }
 0x334   :  { %437 = vsyncadd [#allocation6], 4294967168 }
 0x335   :  { %263 = vsyncpa [#allocation5], 1 }
 0x336   :  { %264 = vsyncpa [#allocation8], 1 }
 0x337   :  { %265 = vsyncpa [#allocation6], 1 }

</bundles_post_ra>
